<compile_context>
chip_gen: v6e
topology: v6e:2x2x1
jax: 0.10.0
libtpu: 0.0.40
codegen_flags: <defaults>
</compile_context>

<pallas_src>
import jax
import jax.numpy as jnp
from jax.experimental import pallas as pl
from jax.experimental.pallas import tpu as pltpu


LANES = 128
SUBLANES = 8
TILE_ROWS_MAX = 1024   # 4 f32 inputs * 1024*128*4B * 2 buffers ~= 4 MiB VMEM
NUM_SHARDS = 2         # leading "parallel" grid axis -> both TCs on v7x


def _cdiv(a, b):
    return (a + b - 1) // b


def _round_up(a, b):
    return _cdiv(a, b) * b


def _loss_kernel(dp_ref, cp_ref, dt_ref, mt_ref, out_ref):
    i = pl.program_id(1)   # inner ("arbitrary") reduction axis

    @pl.when(i == 0)
    def _():
        out_ref[...] = jnp.zeros_like(out_ref)

    dp = dp_ref[...].astype(jnp.float32)
    cp = cp_ref[...].astype(jnp.float32)
    dt = dt_ref[...].astype(jnp.float32)
    mt = mt_ref[...].astype(jnp.float32)

    def fold(x):
        # (tile_rows, 128) -> (8, 128) partial sum: pure vreg-wise VPU adds
        # (reshape groups whole (8,128) vreg tiles, so it is layout-free).
        r, l = x.shape
        return x.reshape(r // SUBLANES, SUBLANES, l).sum(axis=0)

    # ---- masked distance MSE: sum of squared error + valid count ----
    # padded zeros: mt=0, dt=0 -> valid=0 and diff=0 -> contributes 0
    valid = jnp.logical_and(mt > 0.0, dt > 0.0).astype(jnp.float32)
    diff = dp - dt
    out_ref[0, 0, :, :] += fold(valid * diff * diff)
    out_ref[0, 1, :, :] += fold(valid)

    # ---- binary cross entropy (torch semantics: log clamped at -100) ----
    # padded zeros: cp=0, mt=0 -> mt*(-100) = 0, (1-mt)*log(1) = 0 -> bce = 0
    log_c = jnp.maximum(jnp.log(cp), -100.0)
    log_1mc = jnp.maximum(jnp.log(1.0 - cp), -100.0)
    bce = -(mt * log_c + (1.0 - mt) * log_1mc)
    out_ref[0, 2, :, :] += fold(bce)

    # ---- consistency: mse((distance_pred > 0.05).float(), confidence) ----
    # padded zeros: presence(0) = 0, cp = 0 -> contributes 0
    presence = (dp > 0.05).astype(jnp.float32)
    cdiff = presence - cp
    out_ref[0, 3, :, :] += fold(cdiff * cdiff)


def _as_slab(x, rows_total):
    flat = jnp.ravel(x)
    pad = rows_total * LANES - flat.shape[0]
    if pad:  # static Python check; pure (free) reshape when already aligned
        flat = jnp.pad(flat, (0, pad))  # zero padding contributes exactly 0
    return flat.reshape(rows_total, LANES)


def continuous_field_loss(distance_pred, confidence_pred, distance_true, mask_true,
                          distance_weight=1.0, confidence_weight=2.0,
                          consistency_weight=0.1):
    n = distance_pred.size

    rows_needed = _cdiv(n, LANES)
    # multiple of 16 rows so bf16 inputs also tile cleanly; capped at 1024
    tile_rows = min(TILE_ROWS_MAX, _round_up(max(rows_needed, 1), 16))
    rows_total = _round_up(rows_needed, NUM_SHARDS * tile_rows)
    tiles_per_shard = rows_total // (NUM_SHARDS * tile_rows)

    dp = _as_slab(distance_pred, rows_total)
    cp = _as_slab(confidence_pred, rows_total)
    dt = _as_slab(distance_true, rows_total)
    mt = _as_slab(mask_true, rows_total)

    in_spec = pl.BlockSpec((tile_rows, LANES),
                           lambda c, i: (c * tiles_per_shard + i, 0))
    out_spec = pl.BlockSpec((1, 4, SUBLANES, LANES),
                            lambda c, i: (c, 0, 0, 0))

    partials = pl.pallas_call(
        _loss_kernel,
        out_shape=jax.ShapeDtypeStruct((NUM_SHARDS, 4, SUBLANES, LANES),
                                       jnp.float32),
        grid_spec=pltpu.PrefetchScalarGridSpec(
            num_scalar_prefetch=0,
            grid=(NUM_SHARDS, tiles_per_shard),
            in_specs=[in_spec, in_spec, in_spec, in_spec],
            out_specs=out_spec,
        ),
        compiler_params=pltpu.CompilerParams(
            dimension_semantics=("parallel", "arbitrary")),
    )(dp, cp, dt, mt)

    sums = jnp.sum(partials, axis=(0, 2, 3))  # (4,) tiny XLA reduce
    sum_sq, count, sum_bce, sum_cons = sums[0], sums[1], sums[2], sums[3]
    n_f = jnp.float32(n)

    distance_loss = jnp.where(count > 0, sum_sq / jnp.maximum(count, 1.0), 0.0)
    confidence_loss = sum_bce / n_f
    consistency_loss = sum_cons / n_f

    total = (distance_weight * distance_loss
             + confidence_weight * confidence_loss
             + consistency_weight * consistency_loss)

    # TODO(synk): torch returns .item() python floats in the dict; here we keep
    # jax scalars (host sync is the caller's choice).
    return total, {
        "distance_loss": distance_loss,
        "confidence_loss": confidence_loss,
        "consistency_loss": consistency_loss,
    }


def _reference(distance_pred, confidence_pred, distance_true, mask_true,
               dw=1.0, cw=2.0, consw=0.1):
    valid = (mask_true > 0) & (distance_true > 0)
    cnt = jnp.sum(valid)
    d = jnp.where(valid, (distance_pred - distance_true) ** 2, 0.0)
    dist_loss = jnp.where(cnt > 0, jnp.sum(d) / jnp.maximum(cnt, 1), 0.0)
    log_c = jnp.maximum(jnp.log(confidence_pred), -100.0)
    log_1mc = jnp.maximum(jnp.log(1.0 - confidence_pred), -100.0)
    conf_loss = jnp.mean(-(mask_true * log_c + (1.0 - mask_true) * log_1mc))
    presence = (distance_pred > 0.05).astype(jnp.float32)
    cons_loss = jnp.mean((presence - confidence_pred) ** 2)
    total = dw * dist_loss + cw * conf_loss + consw * cons_loss
    return total, dist_loss, conf_loss, cons_loss


if __name__ == "__main__":
    key = jax.random.PRNGKey(0)
    k1, k2, k3, k4 = jax.random.split(key, 4)

    B, C, H, W = 2, 4, 16, 16  # NCHW, PyTorch convention

    distance_pred = jax.random.uniform(k1, (B, C, H, W), jnp.float32,
                                       minval=0.0, maxval=1.0)
    confidence_pred = jax.nn.sigmoid(jax.random.normal(k2, (B, C, H, W)))
    mask_true = (jax.random.uniform(k3, (B, C, H, W)) > 0.5).astype(jnp.float32)
    distance_true = jax.random.uniform(k4, (B, C, H, W), jnp.float32,
                                       minval=0.0, maxval=1.0) * mask_true

    total, parts = continuous_field_loss(distance_pred, confidence_pred,
                                         distance_true, mask_true)
    total = jax.block_until_ready(total)

    ref_total, ref_d, ref_c, ref_cons = _reference(
        distance_pred, confidence_pred, distance_true, mask_true)
    assert jnp.allclose(total, ref_total, rtol=1e-5, atol=1e-5), (total, ref_total)
    assert jnp.allclose(parts["distance_loss"], ref_d, rtol=1e-5, atol=1e-5)
    assert jnp.allclose(parts["confidence_loss"], ref_c, rtol=1e-5, atol=1e-5)
    assert jnp.allclose(parts["consistency_loss"], ref_cons, rtol=1e-5, atol=1e-5)

    print("KERNEL_OK")
</pallas_src>

<mosaic_0001>
module attributes {stable_mosaic.version = 11 : i64} {
  func.func @_loss_kernel(%arg0: i32, %arg1: i32, %arg2: memref<16x128xf32, #tpu.memory_space<vmem>>, %arg3: memref<16x128xf32, #tpu.memory_space<vmem>>, %arg4: memref<16x128xf32, #tpu.memory_space<vmem>>, %arg5: memref<16x128xf32, #tpu.memory_space<vmem>>, %arg6: memref<1x4x8x128xf32, #tpu.memory_space<vmem>>) attributes {dimension_semantics = [#tpu.dimension_semantics<parallel>, #tpu.dimension_semantics<arbitrary>], iteration_bounds = array<i64: 2, 1>, scalar_prefetch = 0 : i64, scratch_operands = 0 : i64, tpu.core_type = #tpu.core_type<tc>, window_params = [{transform_indices = @transform_0, window_bounds = array<i64: 16, 128>}, {transform_indices = @transform_1, window_bounds = array<i64: 16, 128>}, {transform_indices = @transform_2, window_bounds = array<i64: 16, 128>}, {transform_indices = @transform_3, window_bounds = array<i64: 16, 128>}, {transform_indices = @transform_4, window_bounds = array<i64: 1, 4, 8, 128>}]} {
    %c0_i32 = arith.constant 0 : i32
    %0 = arith.cmpi eq, %arg1, %c0_i32 : i32
    %1 = arith.extui %0 : i1 to i32
    %c0_i32_0 = arith.constant 0 : i32
    %2 = arith.cmpi ne, %1, %c0_i32_0 : i32
    scf.if %2 {
      %cst_48 = arith.constant 0.000000e+00 : f32
      %70 = vector.broadcast %cst_48 : f32 to vector<1x4x8x128xf32>
      %c0_49 = arith.constant 0 : index
      %c0_50 = arith.constant 0 : index
      %c0_51 = arith.constant 0 : index
      %c0_52 = arith.constant 0 : index
      %71 = vector.load %arg6[%c0_49, %c0_50, %c0_51, %c0_52] : memref<1x4x8x128xf32, #tpu.memory_space<vmem>>, vector<1x4x8x128xf32>
      tpu.vector_store %arg6[%c0_49, %c0_50, %c0_51, %c0_52], %70 {strides = array<i32>} : memref<1x4x8x128xf32, #tpu.memory_space<vmem>>, vector<1x4x8x128xf32>,
    } else {
    }
    %c0 = arith.constant 0 : index
    %c0_1 = arith.constant 0 : index
    %3 = vector.load %arg2[%c0, %c0_1] : memref<16x128xf32, #tpu.memory_space<vmem>>, vector<16x128xf32>
    %c0_2 = arith.constant 0 : index
    %c0_3 = arith.constant 0 : index
    %4 = vector.load %arg3[%c0_2, %c0_3] : memref<16x128xf32, #tpu.memory_space<vmem>>, vector<16x128xf32>
    %c0_4 = arith.constant 0 : index
    %c0_5 = arith.constant 0 : index
    %5 = vector.load %arg4[%c0_4, %c0_5] : memref<16x128xf32, #tpu.memory_space<vmem>>, vector<16x128xf32>
    %c0_6 = arith.constant 0 : index
    %c0_7 = arith.constant 0 : index
    %6 = vector.load %arg5[%c0_6, %c0_7] : memref<16x128xf32, #tpu.memory_space<vmem>>, vector<16x128xf32>
    %cst = arith.constant 0.000000e+00 : f32
    %7 = vector.broadcast %cst : f32 to vector<16x128xf32>
    %8 = arith.cmpf ogt, %6, %7 : vector<16x128xf32>
    %cst_8 = arith.constant 0.000000e+00 : f32
    %9 = vector.broadcast %cst_8 : f32 to vector<16x128xf32>
    %10 = arith.cmpf ogt, %5, %9 : vector<16x128xf32>
    %11 = arith.andi %8, %10 : vector<16x128xi1>
    %12 = arith.extui %11 : vector<16x128xi1> to vector<16x128xi32>
    %13 = arith.sitofp %12 : vector<16x128xi32> to vector<16x128xf32>
    %14 = arith.subf %3, %5 : vector<16x128xf32>
    %c0_9 = arith.constant 0 : index
    %c0_10 = arith.constant 0 : index
    %c0_11 = arith.constant 0 : index
    %c0_12 = arith.constant 0 : index
    %15 = vector.load %arg6[%c0_9, %c0_10, %c0_11, %c0_12] : memref<1x4x8x128xf32, #tpu.memory_space<vmem>>, vector<1x1x8x128xf32>
    %16 = vector.shape_cast %15 : vector<1x1x8x128xf32> to vector<8x128xf32>
    %17 = arith.mulf %13, %14 : vector<16x128xf32>
    %18 = arith.mulf %17, %14 : vector<16x128xf32>
    %19 = vector.shape_cast %18 : vector<16x128xf32> to vector<2x8x128xf32>
    %cst_13 = arith.constant dense<0.000000e+00> : vector<8x128xf32>
    %20 = vector.multi_reduction <add>, %19, %cst_13 [0] : vector<2x8x128xf32> to vector<8x128xf32>
    %21 = arith.addf %16, %20 : vector<8x128xf32>
    %c0_14 = arith.constant 0 : index
    %c0_15 = arith.constant 0 : index
    %c0_16 = arith.constant 0 : index
    %c0_17 = arith.constant 0 : index
    %22 = vector.load %arg6[%c0_14, %c0_15, %c0_16, %c0_17] : memref<1x4x8x128xf32, #tpu.memory_space<vmem>>, vector<1x1x8x128xf32>
    %23 = vector.shape_cast %22 : vector<1x1x8x128xf32> to vector<8x128xf32>
    %24 = vector.shape_cast %21 : vector<8x128xf32> to vector<1x1x8x128xf32>
    tpu.vector_store %arg6[%c0_14, %c0_15, %c0_16, %c0_17], %24 {strides = array<i32>} : memref<1x4x8x128xf32, #tpu.memory_space<vmem>>, vector<1x1x8x128xf32>,
    %c0_18 = arith.constant 0 : index
    %c1 = arith.constant 1 : index
    %c0_19 = arith.constant 0 : index
    %c0_20 = arith.constant 0 : index
    %25 = vector.load %arg6[%c0_18, %c1, %c0_19, %c0_20] : memref<1x4x8x128xf32, #tpu.memory_space<vmem>>, vector<1x1x8x128xf32>
    %26 = vector.shape_cast %25 : vector<1x1x8x128xf32> to vector<8x128xf32>
    %27 = vector.shape_cast %13 : vector<16x128xf32> to vector<2x8x128xf32>
    %cst_21 = arith.constant dense<0.000000e+00> : vector<8x128xf32>
    %28 = vector.multi_reduction <add>, %27, %cst_21 [0] : vector<2x8x128xf32> to vector<8x128xf32>
    %29 = arith.addf %26, %28 : vector<8x128xf32>
    %c0_22 = arith.constant 0 : index
    %c1_23 = arith.constant 1 : index
    %c0_24 = arith.constant 0 : index
    %c0_25 = arith.constant 0 : index
    %30 = vector.load %arg6[%c0_22, %c1_23, %c0_24, %c0_25] : memref<1x4x8x128xf32, #tpu.memory_space<vmem>>, vector<1x1x8x128xf32>
    %31 = vector.shape_cast %30 : vector<1x1x8x128xf32> to vector<8x128xf32>
    %32 = vector.shape_cast %29 : vector<8x128xf32> to vector<1x1x8x128xf32>
    tpu.vector_store %arg6[%c0_22, %c1_23, %c0_24, %c0_25], %32 {strides = array<i32>} : memref<1x4x8x128xf32, #tpu.memory_space<vmem>>, vector<1x1x8x128xf32>,
    %33 = math.log %4 : vector<16x128xf32>
    %cst_26 = arith.constant -1.000000e+02 : f32
    %34 = vector.broadcast %cst_26 : f32 to vector<16x128xf32>
    %35 = arith.maximumf %33, %34 : vector<16x128xf32>
    %cst_27 = arith.constant 1.000000e+00 : f32
    %36 = vector.broadcast %cst_27 : f32 to vector<16x128xf32>
    %37 = arith.subf %36, %4 : vector<16x128xf32>
    %38 = math.log %37 : vector<16x128xf32>
    %cst_28 = arith.constant -1.000000e+02 : f32
    %39 = vector.broadcast %cst_28 : f32 to vector<16x128xf32>
    %40 = arith.maximumf %38, %39 : vector<16x128xf32>
    %41 = arith.mulf %6, %35 : vector<16x128xf32>
    %cst_29 = arith.constant 1.000000e+00 : f32
    %42 = vector.broadcast %cst_29 : f32 to vector<16x128xf32>
    %43 = arith.subf %42, %6 : vector<16x128xf32>
    %44 = arith.mulf %43, %40 : vector<16x128xf32>
    %45 = arith.addf %41, %44 : vector<16x128xf32>
    %cst_30 = arith.constant 0.000000e+00 : f32
    %46 = vector.broadcast %cst_30 : f32 to vector<16x128xf32>
    %47 = arith.subf %46, %45 : vector<16x128xf32>
    %c0_31 = arith.constant 0 : index
    %c2 = arith.constant 2 : index
    %c0_32 = arith.constant 0 : index
    %c0_33 = arith.constant 0 : index
    %48 = vector.load %arg6[%c0_31, %c2, %c0_32, %c0_33] : memref<1x4x8x128xf32, #tpu.memory_space<vmem>>, vector<1x1x8x128xf32>
    %49 = vector.shape_cast %48 : vector<1x1x8x128xf32> to vector<8x128xf32>
    %50 = vector.shape_cast %47 : vector<16x128xf32> to vector<2x8x128xf32>
    %cst_34 = arith.constant dense<0.000000e+00> : vector<8x128xf32>
    %51 = vector.multi_reduction <add>, %50, %cst_34 [0] : vector<2x8x128xf32> to vector<8x128xf32>
    %52 = arith.addf %49, %51 : vector<8x128xf32>
    %c0_35 = arith.constant 0 : index
    %c2_36 = arith.constant 2 : index
    %c0_37 = arith.constant 0 : index
    %c0_38 = arith.constant 0 : index
    %53 = vector.load %arg6[%c0_35, %c2_36, %c0_37, %c0_38] : memref<1x4x8x128xf32, #tpu.memory_space<vmem>>, vector<1x1x8x128xf32>
    %54 = vector.shape_cast %53 : vector<1x1x8x128xf32> to vector<8x128xf32>
    %55 = vector.shape_cast %52 : vector<8x128xf32> to vector<1x1x8x128xf32>
    tpu.vector_store %arg6[%c0_35, %c2_36, %c0_37, %c0_38], %55 {strides = array<i32>} : memref<1x4x8x128xf32, #tpu.memory_space<vmem>>, vector<1x1x8x128xf32>,
    %cst_39 = arith.constant 5.000000e-02 : f32
    %56 = vector.broadcast %cst_39 : f32 to vector<16x128xf32>
    %57 = arith.cmpf ogt, %3, %56 : vector<16x128xf32>
    %58 = arith.extui %57 : vector<16x128xi1> to vector<16x128xi32>
    %59 = arith.sitofp %58 : vector<16x128xi32> to vector<16x128xf32>
    %60 = arith.subf %59, %4 : vector<16x128xf32>
    %c0_40 = arith.constant 0 : index
    %c3 = arith.constant 3 : index
    %c0_41 = arith.constant 0 : index
    %c0_42 = arith.constant 0 : index
    %61 = vector.load %arg6[%c0_40, %c3, %c0_41, %c0_42] : memref<1x4x8x128xf32, #tpu.memory_space<vmem>>, vector<1x1x8x128xf32>
    %62 = vector.shape_cast %61 : vector<1x1x8x128xf32> to vector<8x128xf32>
    %63 = arith.mulf %60, %60 : vector<16x128xf32>
    %64 = vector.shape_cast %63 : vector<16x128xf32> to vector<2x8x128xf32>
    %cst_43 = arith.constant dense<0.000000e+00> : vector<8x128xf32>
    %65 = vector.multi_reduction <add>, %64, %cst_43 [0] : vector<2x8x128xf32> to vector<8x128xf32>
    %66 = arith.addf %62, %65 : vector<8x128xf32>
    %c0_44 = arith.constant 0 : index
    %c3_45 = arith.constant 3 : index
    %c0_46 = arith.constant 0 : index
    %c0_47 = arith.constant 0 : index
    %67 = vector.load %arg6[%c0_44, %c3_45, %c0_46, %c0_47] : memref<1x4x8x128xf32, #tpu.memory_space<vmem>>, vector<1x1x8x128xf32>
    %68 = vector.shape_cast %67 : vector<1x1x8x128xf32> to vector<8x128xf32>
    %69 = vector.shape_cast %66 : vector<8x128xf32> to vector<1x1x8x128xf32>
    tpu.vector_store %arg6[%c0_44, %c3_45, %c0_46, %c0_47], %69 {strides = array<i32>} : memref<1x4x8x128xf32, #tpu.memory_space<vmem>>, vector<1x1x8x128xf32>,
    return
  }
  func.func @transform_0(%arg0: i32, %arg1: i32) -> (i32, i32) {
    %c1_i32 = arith.constant 1 : i32
    %0 = arith.muli %arg0, %c1_i32 : i32
    %1 = arith.addi %0, %arg1 : i32
    %c0_i32 = arith.constant 0 : i32
    %c0_i32_0 = arith.constant 0 : i32
    return %1, %c0_i32 : i32, i32
  }
  func.func @transform_1(%arg0: i32, %arg1: i32) -> (i32, i32) {
    %c1_i32 = arith.constant 1 : i32
    %0 = arith.muli %arg0, %c1_i32 : i32
    %1 = arith.addi %0, %arg1 : i32
    %c0_i32 = arith.constant 0 : i32
    %c0_i32_0 = arith.constant 0 : i32
    return %1, %c0_i32 : i32, i32
  }
  func.func @transform_2(%arg0: i32, %arg1: i32) -> (i32, i32) {
    %c1_i32 = arith.constant 1 : i32
    %0 = arith.muli %arg0, %c1_i32 : i32
    %1 = arith.addi %0, %arg1 : i32
    %c0_i32 = arith.constant 0 : i32
    %c0_i32_0 = arith.constant 0 : i32
    return %1, %c0_i32 : i32, i32
  }
  func.func @transform_3(%arg0: i32, %arg1: i32) -> (i32, i32) {
    %c1_i32 = arith.constant 1 : i32
    %0 = arith.muli %arg0, %c1_i32 : i32
    %1 = arith.addi %0, %arg1 : i32
    %c0_i32 = arith.constant 0 : i32
    %c0_i32_0 = arith.constant 0 : i32
    return %1, %c0_i32 : i32, i32
  }
  func.func @transform_4(%arg0: i32, %arg1: i32) -> (i32, i32, i32, i32) {
    %c0_i32 = arith.constant 0 : i32
    %c0_i32_0 = arith.constant 0 : i32
    %c0_i32_1 = arith.constant 0 : i32
    %c0_i32_2 = arith.constant 0 : i32
    return %arg0, %c0_i32, %c0_i32_0, %c0_i32_1 : i32, i32, i32, i32
  }
}

</mosaic_0001>

<bundles_post_ra>
// kernel: tpu_custom_call.1
= control target key start
LH: loop header
LB: loop body
LE: loop exit
PB: predicated region body
PF: predicated region fallthrough
CT: control target
= control target key end

     0   :  { %s1233_s0 = inlined_call_operand.hbm [shape: f32[32,128], index: 0, kind: input, shape index: {}]   ;;  %s1234_s1 = inlined_call_operand.hbm [shape: f32[32,128], index: 1, kind: input, shape index: {}]   ;;  %s1235_s2 = inlined_call_operand.hbm [shape: f32[32,128], index: 2, kind: input, shape index: {}]   ;;  %s1236_s3 = inlined_call_operand.hbm [shape: f32[32,128], index: 3, kind: input, shape index: {}]   ;;  %s1237_s4 = inlined_call_operand.hbm [shape: f32[2,4,8,128], index: 4, kind: output, shape index: {}]  }
   0x1   :  { %1244 = sst [smem:[#allocation20_spill]] %s1234_s1 }
   0x2   :  { %9 = vsyncpa [#allocation3], 0 }
   0x3   :  { %11 = vsyncpa [#allocation3 + $0x1], 0 }
   0x4   :  { %12 = vsyncpa [#allocation6], 0 }
   0x5   :  { %14 = vsyncpa [#allocation6 + $0x1], 0 }
   0x6   :  { %15 = vsyncpa [#allocation9], 0 }
   0x7   :  { %17 = vsyncpa [#allocation9 + $0x1], 0 }
   0x8   :  { %18 = vsyncpa [#allocation4], 0 }
   0x9   :  { %20 = vsyncpa [#allocation4 + $0x1], 0  ;;  %s984_s15 = smov 0   ;;  %s986_s16 = smov 0  }
   0xa   :  { %s988_s17 = smov 0   ;;  %s990_s18 = smov 0  }
   0xb   :  { %s992_s19 = smov 0   ;;  %s994_s20 = smov 0  }
   0xc LB: > { %1245 = sst [smem:[#allocation15_spill]] %s935_s17  ;;  %s1015_s21 = sadd.s32 4294967295, %s947_s20   ;;  %s947_s20 = sphi %s994_s20, %s26_s20   ;;  %s943_s19 = sphi %s992_s19, %s1263_s19   ;;  %s939_s18 = sphi %s990_s18, %s1262_s18   ;;  %s935_s17 = sphi %s988_s17, %s1261_s17   ;;  %s931_s16 = sphi %s986_s16, %s1265_s16   ;;  %s927_s15 = sphi %s984_s15, %s1264_s15  }
   0xd   : > { %1246 = sst [smem:[#allocation16_spill]] %s943_s19  ;;  %s616_s22 = sadd.s32 4294967294, %s947_s20  }
   0xe   : > { %s38_s23 = sadd.s32 1, %s943_s19  ;;  %s47_s24 = sadd.s32 1, %s935_s17 }
   0xf   : > { %p40_p0 = scmp.ge.s32.totalorder %s38_s23, 2  ;;  %p54_p1 = scmp.ne.s32.totalorder %s935_s17, %s931_s16 }
  0x10   : > { %p55_p2 = scmp.eq.s32.totalorder %s947_s20, 0  ;;  %p60_p3 = scmp.ne.s32.totalorder %s931_s16, %s927_s15 }
  0x11   : > { %s1267_s23 = smov (%p40_p0, %s38_s23), 0  ;;  %p61_p5 = scmp.eq.s32.totalorder %s1015_s21, 0 }
  0x12   : > { %1247 = sst [smem:[#allocation17_spill]] %s1267_s23  ;;  %p1027_p4 = por %p55_p2, %p54_p1 }
  0x13   : > { %s44_s26 = ssub.s32 %s943_s19, %s1267_s23  ;;  %p168_p6 = scmp.eq.s32.totalorder %s1015_s21, 1 }
  0x14   : > { %p45_p7 = scmp.eq.s32.totalorder %s44_s26, 0  ;;  %p1035_p8 = por %p61_p5, %p60_p3 }
  0x15   : > { %p1039_p9 = por %p168_p6, %p54_p1  ;;  %p174_p10 = scmp.eq.s32.totalorder %s616_s22, 1 }
  0x16   : > { %s1044_s29 = scalar_select %p45_p7, %s935_s17, %s47_s24  }
  0x17   : > { %p1046_p11 = por %p174_p10, %p60_p3  ;;  %p684_p13 = scmp.lt.s32.totalorder %s947_s20, 2 }
  0x18   : > { %1251 = sst [smem:[#allocation18_spill]] %s1044_s29  ;;  %s1053_s5 = sand.u32 1, %s935_s17  }
  0x19   : > { %s1252_s30 = scalar_select %p1046_p11, 1, 0 }
  0x1a   : > { %s1056_s6 = sshll.u32 %s1053_s5, 4  ;;  %s1059_s7 = sshll.u32 %s943_s19, 8 }
  0x1b   : > { %1253 = sst [smem:[#allocation19_spill]] %s1252_s30  ;;  %p1063_p0 = pnand %p684_p13, %p1027_p4 }
  0x1c   : > { %s216_s9 = sand.u32 1, %s947_s20   ;;  %s1255_s1 = sld [smem:[#allocation20_spill]] }
  0x1d   : > { %s220_s13 = scalar_lea.vmem [#allocation5], %s1056_s6  ;;  %p631_p1 = scmp.ge.s32.totalorder %s947_s20, 1 }
  0x1e   : > { %s228_s14 = sshll.u32 %s220_s13, 4  ;;  %p280_p2 = scmp.lt.s32.totalorder %s947_s20, 3  ;;  %s229_s14 = int_to_ptr.vmem [resolvable:$true] %s228_s14 }
  0x1f   : > { %s1075_s22 = scalar_lea.sflag [#allocation6], %s216_s9  ;;  %p749_p3 = pneg %p1063_p0 }
  0x20   : > { %s760_s24 = scalar_lea.vmem %s229_s14, 256  ;;  %s949_s25 = smov [#allocation5]  }
  0x21   : > { %p761_p4 = scmp.ne.s32.totalorder %s229_s14, %s760_s24  ;;  %s765_s26 = sshll.u32 %s949_s25, 4  ;;  %s766_s26 = int_to_ptr.vmem [resolvable:$false] %s765_s26 }
  0x22   : > { %s227_s12 = scalar_lea.hbm %s1255_s1, %s1059_s7  ;;  %s767_s10 = scalar_lea.vmem %s766_s26, 512 }
  0x23   : > { %p763_p5 = pnand %p761_p4, %p749_p3  ;;  %p768_p7 = scmp.lt.s32.totalorder %s229_s14, %s766_s26 }
  0x24   : > { %p769_p10 = scmp.lt.s32.totalorder %s767_s10, %s760_s24 }
  0x25   : > { %p764_p6 = pneg %p763_p5 }
  0x26   : > { %p770_p13 = por %p769_p10, %p768_p7 }
  0x28   : > { %p771_p12 = pnand %p770_p13, %p764_p6 }
  0x2a   : > { %774 = shalt.err (!%p771_p12)
}
  0x2b   : > { %s1242_s11 = smov 128   ;;  %s951_s9 = smov 8  }
  0x2c   : > { %673 = dma.hbm_to_vmem [thread:$0]  (!%p1063_p0), %s227_s12, 256, %s229_s14, %s1075_s22, %s1242_s11, %s1242_s11, %s951_s9  }
  0x2d   : > { %p1092_p4 = pnand %p631_p1, %p280_p2  ;;  %s205_s26 = scalar_lea.hbm %s1233_s0, %s1059_s7 }
  0x2e   : > { %s198_s10 = scalar_lea.vmem [#allocation2], %s1056_s6  ;;  %s249_s29 = scalar_lea.hbm %s1235_s2, %s1059_s7 }
  0x2f   : > { %s206_s1 = sshll.u32 %s198_s10, 4  ;;  %s195_s17 = scalar_lea.sflag [#allocation3], %s1053_s5  ;;  %s207_s1 = int_to_ptr.vmem [resolvable:$true] %s206_s1 }
  0x30   : > { %s788_s30 = scalar_lea.vmem %s207_s1, 256  ;;  %s952_s12 = smov [#allocation2]  }
  0x31   : > { %p789_p12 = scmp.ne.s32.totalorder %s207_s1, %s788_s30  ;;  %s793_s14 = sshll.u32 %s952_s12, 4  ;;  %s794_s14 = int_to_ptr.vmem [resolvable:$false] %s793_s14 }
  0x32   : > { %s795_s11 = scalar_lea.vmem %s794_s14, 512  ;;  %p796_p5 = scmp.lt.s32.totalorder %s207_s1, %s794_s14 }
  0x33   : > { %p791_p1 = pnand %p789_p12, %p749_p3  ;;  %p797_p6 = scmp.lt.s32.totalorder %s795_s11, %s788_s30 }
  0x35   : > { %p792_p2 = pneg %p791_p1  ;;  %p798_p7 = por %p797_p6, %p796_p5 }
  0x37   : > { %p799_p10 = pnand %p798_p7, %p792_p2 }
  0x39   : > { %802 = shalt.err (!%p799_p10)
}
  0x3a   : > { %s1257_s19 = smov 128   ;;  %s242_s23 = scalar_lea.vmem [#allocation7], %s1056_s6 }
  0x3b   : > { %670 = dma.hbm_to_vmem [thread:$0]  (!%p1063_p0), %s205_s26, 256, %s207_s1, %s195_s17, %s1257_s19, %s1257_s19, %s951_s9  }
  0x3c   : > { %s250_s24 = sshll.u32 %s242_s23, 4  ;;  %s953_s30 = smov [#allocation7]   ;;  %s251_s24 = int_to_ptr.vmem [resolvable:$true] %s250_s24 }
  0x3d   : > { %s816_s25 = scalar_lea.vmem %s251_s24, 256  ;;  %s821_s11 = sshll.u32 %s953_s30, 4  ;;  %s822_s11 = int_to_ptr.vmem [resolvable:$false] %s821_s11 }
  0x3e   : > { %p817_p13 = scmp.ne.s32.totalorder %s251_s24, %s816_s25  ;;  %s823_s10 = scalar_lea.vmem %s822_s11, 512 }
  0x3f   : > { %p824_p2 = scmp.lt.s32.totalorder %s251_s24, %s822_s11  ;;  %p825_p5 = scmp.lt.s32.totalorder %s823_s10, %s816_s25 }
  0x40   : > { %p819_p12 = pnand %p817_p13, %p749_p3 }
  0x41   : > { %p826_p6 = por %p825_p5, %p824_p2 }
  0x42   : > { %p820_p1 = pneg %p819_p12 }
  0x44   : > { %p827_p7 = pnand %p826_p6, %p820_p1 }
  0x46   : > { %830 = shalt.err (!%p827_p7)
}
  0x47   : > { %676 = dma.hbm_to_vmem [thread:$0]  (!%p1063_p0), %s249_s29, 256, %s251_s24, %s1075_s22, %s1257_s19, %s1257_s19, %s951_s9  }
  0x48   : > { %s271_s14 = scalar_lea.hbm %s1236_s3, %s1059_s7  ;;  %s264_s23 = scalar_lea.vmem [#allocation8], %s1056_s6 }
  0x49   : > { %s272_s25 = sshll.u32 %s264_s23, 4  ;;  %s261_s30 = scalar_lea.sflag [#allocation9], %s1053_s5  ;;  %s273_s25 = int_to_ptr.vmem [resolvable:$true] %s272_s25 }
  0x4a   : > { %s844_s11 = scalar_lea.vmem %s273_s25, 256  ;;  %s954_s10 = smov [#allocation8]  }
  0x4b   : > { %p845_p10 = scmp.ne.s32.totalorder %s273_s25, %s844_s11  ;;  %s849_s1 = sshll.u32 %s954_s10, 4  ;;  %s850_s1 = int_to_ptr.vmem [resolvable:$false] %s849_s1 }
  0x4c   : > { %s851_s17 = scalar_lea.vmem %s850_s1, 512  ;;  %p852_p1 = scmp.lt.s32.totalorder %s273_s25, %s850_s1 }
  0x4d   : > { %p847_p13 = pnand %p845_p10, %p749_p3  ;;  %p853_p2 = scmp.lt.s32.totalorder %s851_s17, %s844_s11 }
  0x4f   : > { %p848_p12 = pneg %p847_p13  ;;  %p854_p5 = por %p853_p2, %p852_p1 }
  0x51   : > { %p855_p6 = pnand %p854_p5, %p848_p12 }
  0x53   : > { %858 = shalt.err (!%p855_p6)
}
  0x54   : > { %679 = dma.hbm_to_vmem [thread:$0]  (!%p1063_p0), %s271_s14, 256, %s273_s25, %s261_s30, %s1257_s19, %s1257_s19, %s951_s9  }
  0x55   : > { %284 = sbr.rel (%p1092_p4) target bundleno = 144 (0x90), region = 36  ;;  %s1146_s29 = sand.u32 (!%p1092_p4), 1, %s931_s16  }
  0x56   : > { %s1149_s5 = sshll.u32 (!%p1092_p4), %s1146_s29, 4  ;;  %s287_s6 = scalar_lea.sflag (!%p1092_p4), [#allocation3], %s1146_s29 }
  0x57   : > { %s290_s7 = scalar_lea.vmem (!%p1092_p4), [#allocation2], %s1149_s5 }
  0x5a   : > { %910 = dma.done.wait (%p1035_p8), %s287_s6, 256  }
  0x5b   : > { %912 = vsyncadd (%p1035_p8), %s287_s6, 4294967040  ;;  %s295_s8 = sand.u32 1, %s1015_s21   ;;  %s299_s9 = scalar_lea.vmem [#allocation5], %s1149_s5 }
  0x5c   : > { %s296_s22 = scalar_lea.sflag [#allocation6], %s295_s8 }
  0x5d   : > { %914 = dma.done.wait (%p1035_p8), %s296_s22, 512  }
  0x5e   : > { %916 = vsyncadd (%p1035_p8), %s296_s22, 4294966784  ;;  %s308_s13 = scalar_lea.vmem [#allocation7], %s1149_s5  ;;  %s314_s19 = scalar_lea.sflag [#allocation9], %s1146_s29 }
  0x5f   : > { %s317_s24 = scalar_lea.vmem [#allocation8], %s1149_s5 }
  0x60   : > { %918 = dma.done.wait (%p1035_p8), %s314_s19, 256  }
  0x61   : > { %920 = vsyncadd (%p1035_p8), %s314_s19, 4294967040  ;;  %v373_v0 = vld [vmem:[%s290_s7] sm:$0xff]  ;;  %v374_v1 = vld [vmem:[%s290_s7 + $0x8] sm:$0xff]  ;;  %s636_s21 = sshll.u32 %s1146_s29, 5  ;;  %v955_v12 = vmov 0.0   ;;  %s656_s26 = sshll.u32 %s939_s18, 9 }
  0x62   : > { %v377_v2 = vld [vmem:[%s308_s13] sm:$0xff]  ;;  %v378_v3 = vld [vmem:[%s308_s13 + $0x8] sm:$0xff]  ;;  %vm435_vm1 = vcmp.gt.f32.partialorder %v373_v0, 0.05  ;;  %vm436_vm7 = vcmp.gt.f32.partialorder %v374_v1, 0.05  ;;  %s1182_s25 = scalar_lea.hbm %s1237_s4, %s656_s26 }
  0x63   : > { %v379_v4 = vld [vmem:[%s317_s24] sm:$0xff]  ;;  %v380_v5 = vld [vmem:[%s317_s24 + $0x8] sm:$0xff]  ;;  %vm383_vm0 = vcmp.gt.f32.partialorder %v377_v2, 0.0  ;;  %v391_v6 = vsub.f32 %v373_v0, %v377_v2  ;;  %vm384_vm4 = vcmp.gt.f32.partialorder %v378_v3, 0.0  ;;  %v392_v7 = vsub.f32 %v374_v1, %v378_v3  ;;  %s1172_s27 = scalar_lea.vmem [#allocation10], %s636_s21  ;;  %s451_s30 = scalar_lea.sflag [#allocation4], %s1146_s29 }
  0x64   : > { %vm381_vm2 = vcmp.gt.f32.partialorder %v379_v4, 0.0  ;;  %vm382_vm3 = vcmp.gt.f32.partialorder %v380_v5, 0.0  ;;  %v375_v8 = vld [vmem:[%s299_s9] sm:$0xff]  ;;  %v376_v9 = vld [vmem:[%s299_s9 + $0x8] sm:$0xff]  ;;  %v643_v16 = vsel %vm435_vm1, 1.0, %v955_v12  ;;  %v644_v19 = vsel %vm436_vm7, 1.0, %v955_v12 }
  0x65   : > { %vm385_vm5 = vmand %vm381_vm2, %vm383_vm0  ;;  %739 = vlog2.f32 %v375_v8  ;;  %v412_v10 = vsub.f32 1.0, %v375_v8  ;;  %v413_v11 = vsub.f32 1.0, %v376_v9  ;;  %v441_v21 = vsub.f32 %v643_v16, %v375_v8  ;;  %s464_s12 = sshll.u32 %s1172_s27, 4  ;;  %s956_s18 = smov [#allocation10]   ;;  %s1184_s12 = int_to_ptr.vmem [resolvable:$true] %s464_s12 }
  0x66   : > { %vm386_vm6 = vmand %vm382_vm3, %vm384_vm4  ;;  %v637_v13 = vsel %vm385_vm5, 1.0, %v955_v12  ;;  %741 = vlog2.f32 %v376_v9  ;;  %v442_v22 = vsub.f32 %v644_v19, %v376_v9  ;;  %v422_v36 = vsub.f32 1.0, %v379_v4  ;;  %s859_s11 = scalar_lea.vmem %s1184_s12, 512  ;;  %s863_s10 = sshll.u32 %s956_s18, 4  ;;  %s864_s10 = int_to_ptr.vmem [resolvable:$false] %s863_s10 }
  0x67   : > { %v638_v14 = vsel %vm386_vm6, 1.0, %v955_v12  ;;  %v394_v15 = vmul.f32 %v637_v13, %v391_v6  ;;  %743 = vlog2.f32 %v412_v10  ;;  %v445_v24 = vmul.f32 %v441_v21, %v441_v21  ;;  %p860_p8 = scmp.ne.s32.totalorder %s1184_s12, %s859_s11  ;;  %s865_s1 = scalar_lea.vmem %s864_s10, 1024 }
  0x68   : > { %v395_v17 = vmul.f32 %v638_v14, %v392_v7  ;;  %v403_v18 = vadd.f32 %v638_v14, %v637_v13  ;;  %745 = vlog2.f32 %v413_v11  ;;  %v446_v25 = vmul.f32 %v442_v22, %v442_v22  ;;  %p866_p4 = scmp.lt.s32.totalorder %s1184_s12, %s864_s10  ;;  %p867_p7 = scmp.lt.s32.totalorder %s865_s1, %s859_s11 }
  0x69   : > { %v396_v20 = vmul.f32 %v394_v15, %v391_v6  ;;  %v423_v39 = vsub.f32 1.0, %v380_v5  ;;  %p861_p0 = pnand %p860_p8, %p1039_p9 }
  0x6a   : > { %v397_v23 = vmul.f32 %v395_v17, %v392_v7  ;;  %640 = vst [vmem:[%s1172_s27 + $0x8] sm:$0xff] %v403_v18  ;;  %v447_v27 = vadd.f32 %v446_v25, %v445_v24  ;;  %p868_p10 = por %p867_p7, %p866_p4 }
  0x6b   : > { %p862_p3 = pneg %p861_p0 }
  0x6c   : > { %v398_v26 = vadd.f32 %v397_v23, %v396_v20  ;;  %646 = vst [vmem:[%s1172_s27 + $0x18] sm:$0xff] %v447_v27 }
  0x6d   : > { %p869_p13 = pnand %p868_p10, %p862_p3 }
  0x6e   : > { %400 = vst [vmem:[%s1172_s27] sm:$0xff] %v398_v26 }
  0x72   : > { %v740_v28 = vpop.eup %739 }
  0x73   : > { %v742_v29 = vpop.eup %741  ;;  %v407_v30 = vmul.f32 0.6931472, %v740_v28 }
  0x74   : > { %v744_v31 = vpop.eup %743  ;;  %v409_v32 = vmul.f32 0.6931472, %v742_v29 }
  0x75   : > { %v746_v33 = vpop.eup %745  ;;  %v410_v34 = vmax.f32 %v407_v30, -100.0  ;;  %v415_v35 = vmul.f32 0.6931472, %v744_v31 }
  0x76   : > { %v411_v37 = vmax.f32 %v409_v32, -100.0  ;;  %v417_v38 = vmul.f32 0.6931472, %v746_v33 }
  0x77   : > { %v418_v40 = vmax.f32 %v415_v35, -100.0  ;;  %v420_v41 = vmul.f32 %v410_v34, %v379_v4 }
  0x78   : > { %v419_v42 = vmax.f32 %v417_v38, -100.0  ;;  %v421_v43 = vmul.f32 %v411_v37, %v380_v5 }
  0x79   : > { %v424_v44 = vmul.f32 %v422_v36, %v418_v40 }
  0x7a   : > { %v425_v45 = vmul.f32 %v423_v39, %v419_v42 }
  0x7b   : > { %v426_v46 = vadd.f32 %v424_v44, %v420_v41 }
  0x7c   : > { %v427_v47 = vadd.f32 %v425_v45, %v421_v43 }
  0x7d   : > { %v428_v48 = vsub.f32 0.0, %v426_v46 }
  0x7e   : > { %v429_v49 = vsub.f32 0.0, %v427_v47 }
  0x80   : > { %v432_v50 = vadd.f32 %v429_v49, %v428_v48 }
  0x82   : > { %642 = vst [vmem:[%s1172_s27 + $0x10] sm:$0xff] %v432_v50 }
  0x83   : > { %872 = shalt.err (!%p869_p13)
}
  0x84   : > { %s873_s17 = scalar_lea.hbm %s1182_s25, 512  ;;  %s877_s7 = scalar_lea.hbm %s1237_s4, 1024 }
  0x85   : > { %p874_p12 = scmp.ne.s32.totalorder %s1182_s25, %s873_s17  ;;  %p878_p5 = scmp.lt.s32.totalorder %s1182_s25, %s1237_s4 }
  0x86   : > { %p879_p6 = scmp.lt.s32.totalorder %s877_s7, %s873_s17 }
  0x87   : > { %p875_p1 = pnand %p874_p12, %p1039_p9 }
  0x88   : > { %p880_p8 = por %p879_p6, %p878_p5 }
  0x89   : > { %p876_p2 = pneg %p875_p1 }
  0x8b   : > { %p881_p0 = pnand %p880_p8, %p876_p2 }
  0x8d   : > { %884 = shalt.err (!%p881_p0)
}
  0x8e   : > { %s957_s9 = smov 128   ;;  %s958_s13 = smov 8  }
  0x8f   : > { %665 = dma.vmem_to_hbm [thread:$0]  (%p1039_p9), %s1184_s12, 512, %s1182_s25, %s451_s30, %s957_s9, %s957_s9, %s958_s13  }
  0x90 PF: > { %s479_s24 = sand.u32 1, %s927_s15   ;;  %p1259_p3 = scmp.ge.s32.totalorder %s947_s20, 2 }
  0x91   : > { %s480_s21 = scalar_lea.sflag [#allocation4], %s479_s24 }
  0x92   : > { %p681_p4 = pnand %p1259_p3, %p1046_p11 }
  0x94   : > { %p682_p7 = pneg %p681_p4 }
  0x96   : > { %922 = dma.done.wait (%p682_p7), %s480_s21, 512  }
  0x97   : > { %924 = vsyncadd (%p682_p7), %s480_s21, 4294966784  ;;  %s26_s20 = sadd.s32 1, %s947_s20   ;;  %s1260_s27 = sld [smem:[#allocation15_spill]] }
  0x98   : > { %p23_p10 = scmp.ge.s32.totalorder %s26_s20, 4   ;;  %s1261_s17 = sld [smem:[#allocation18_spill]] }
  0x99   : > { %s1262_s18 = sld [smem:[#allocation16_spill]]  ;;  %s1264_s15 = smov %s931_s16 }
  0x9a   : > { %s1263_s19 = sld [smem:[#allocation17_spill]]  ;;  %25 = sbr.rel (!%p23_p10) target bundleno = 12 (0xc), region = 125 }
  0x9d   : > { %s1265_s16 = smov %s1260_s27 }
  0x9f   :  { %485 = vsyncpa [#allocation3], 1 }
  0xa0   :  { %487 = vsyncpa [#allocation3 + $0x1], 1 }
  0xa1   :  { %488 = vsyncpa [#allocation6], 1 }
  0xa2   :  { %490 = vsyncpa [#allocation6 + $0x1], 1 }
  0xa3   :  { %491 = vsyncpa [#allocation9], 1 }
  0xa4   :  { %493 = vsyncpa [#allocation9 + $0x1], 1 }
  0xa5   :  { %494 = vsyncpa [#allocation4], 1 }
  0xa6   :  { %496 = vsyncpa [#allocation4 + $0x1], 1 }

</bundles_post_ra>
